<compile_context>
chip_gen: v7x
topology: tpu7x:2x2x1
jax: 0.10.0
libtpu: 0.0.40
codegen_flags: <defaults>
</compile_context>

<pallas_src>
import functools

import jax
import jax.numpy as jnp
from jax.experimental import pallas as pl
from jax.experimental.pallas import tpu as pltpu

_LANE_CHOICES = (1024, 512, 256, 128)
_MIB = 1024 * 1024


def _sigmoid_mod_kernel(x_ref, o_ref):
    # Compute in f32 (v5e VPU/EUP have no bf16 path); cast back on store.
    x = x_ref[...].astype(jnp.float32)
    # Exact identity: 1/(1+exp(-0.4x)) == 0.5*tanh(0.2x) + 0.5.
    # Single EUP op; avoids the f32 divide (reciprocal + Newton) after exp.
    o_ref[...] = (0.5 * jnp.tanh(0.2 * x) + 0.5).astype(o_ref.dtype)


@functools.lru_cache(maxsize=1)
def _chip_config():
    """Returns (target_block_bytes, vmem_limit_bytes_or_None, num_tensorcores)."""
    try:
        kind = jax.devices()[0].device_kind.lower()
    except Exception:  # interpret / CPU fallback
        kind = ""
    if "v7" in kind or "7x" in kind:
        # v7x: 2 TCs, 64 MiB physical VMEM.  4 MiB blocks -> 16 MiB live
        # (in+out double buffered), inside the 32 MiB scoped limit.
        return 4 * _MIB, 32 * _MIB, 2
    if "v6" in kind:
        # v6e: 1 TC, 128 MiB VMEM.  Bigger blocks amortize per-step overhead.
        return 4 * _MIB, 32 * _MIB, 1
    # v5e / unknown: 16 MiB scoped-VMEM default -> keep ~2 MiB blocks
    # (8 MiB live), no explicit override needed.
    return 2 * _MIB, None, 1


def _sublane_multiple(dtype) -> int:
    # Native sublane tile: 8 rows for 4-byte, 16 for 2-byte, 32 for 1-byte.
    return max(8, 32 // jnp.dtype(dtype).itemsize)


def _run_2d(x2d: jax.Array, tile_rows: int) -> jax.Array:
    """One pallas_call over a lane-dense (rows, lanes) slab."""
    rows, lanes = x2d.shape
    _, vmem_limit, _ = _chip_config()
    grid = (pl.cdiv(rows, tile_rows),)  # ragged last block is auto-masked
    # TODO(synk): verify in xprof that "parallel" actually shards this axis
    # across both v7x TensorCores; if not, switch to pltpu.CORE_PARALLEL.
    return pl.pallas_call(
        _sigmoid_mod_kernel,
        out_shape=jax.ShapeDtypeStruct((rows, lanes), x2d.dtype),
        grid_spec=pltpu.PrefetchScalarGridSpec(
            num_scalar_prefetch=0,
            grid=grid,
            in_specs=[pl.BlockSpec((tile_rows, lanes), lambda i: (i, 0))],
            out_specs=pl.BlockSpec((tile_rows, lanes), lambda i: (i, 0)),
        ),
        compiler_params=pltpu.CompilerParams(
            dimension_semantics=("parallel",),
            vmem_limit_bytes=vmem_limit,
        ),
    )(x2d)


def _sigmoid_flat_divisible(x_flat: jax.Array) -> jax.Array:
    """x_flat.size is a multiple of 128. No padding, no slicing."""
    n = x_flat.size
    lanes = next(L for L in _LANE_CHOICES if n % L == 0)
    rows = n // lanes

    block_bytes, _, num_tc = _chip_config()
    sub = _sublane_multiple(x_flat.dtype)
    itemsize = jnp.dtype(x_flat.dtype).itemsize
    max_tile_rows = max(sub, (block_bytes // (lanes * itemsize)) // sub * sub)

    if rows <= max_tile_rows:
        if num_tc >= 2 and rows >= 2 * sub:
            # v7x: split into 2 (near-)balanced blocks so both TCs get work.
            tile_rows = pl.cdiv(pl.cdiv(rows, 2), sub) * sub
        else:
            # Single TensorCore: one full block, no pointless extra grid step.
            tile_rows = rows
    else:
        if num_tc >= 2:
            # Balanced, even block count across the two TensorCores (avoid a
            # max-size block paired with a 1-row straggler).
            num_blocks = 2 * pl.cdiv(rows, 2 * max_tile_rows)
            tile_rows = pl.cdiv(pl.cdiv(rows, num_blocks), sub) * sub
        else:
            tile_rows = max_tile_rows  # ragged last block is fine serially

    out2d = _run_2d(x_flat.reshape(rows, lanes), tile_rows)
    return out2d.reshape(n)


def sigmoid_mod(x: jax.Array) -> jax.Array:
    """Elementwise 1/(1+exp(-0.4*x)) via Pallas TPU kernels. Any shape."""
    orig_shape = x.shape
    # Integer inputs: PyTorch's exp promotes to float; mirror that so the
    # (0,1) sigmoid output is not truncated back to integers.
    if not jnp.issubdtype(x.dtype, jnp.floating):
        x = x.astype(jnp.float32)
    n = x.size
    if n == 0:
        return x.reshape(orig_shape)

    x_flat = x.reshape(n)
    rem = n % 128

    if rem == 0:
        # Fast path: pure reshapes, no pad / no slice, single kernel launch.
        return _sigmoid_flat_divisible(x_flat).reshape(orig_shape)

    if n < 128:
        # Whole array smaller than one lane row: one padded (1,128) block.
        padded = jnp.pad(x_flat, (0, 128 - n)).reshape(1, 128)
        return _run_2d(padded, 1).reshape(128)[:n].reshape(orig_shape)

    # Ragged: 128-divisible bulk via the fast path; the (<128 element) tail is
    # not worth a kernel launch -- plain jnp/XLA handles it.
    # TODO(synk): the concatenate is one extra pass over the output; conv-net
    # activation shapes are 128-divisible, so this path is not hit in practice.
    bulk = n - rem
    bulk_out = _sigmoid_flat_divisible(x_flat[:bulk])
    tail = x_flat[bulk:].astype(jnp.float32)
    tail_out = (0.5 * jnp.tanh(0.2 * tail) + 0.5).astype(x.dtype)
    return jnp.concatenate([bulk_out, tail_out]).reshape(orig_shape)


if __name__ == "__main__":
    key = jax.random.PRNGKey(0)

    # Primary check: NCHW input consistent with a conv-net style module.
    x = jax.random.normal(key, (2, 4, 16, 16), dtype=jnp.float32)
    y = jax.block_until_ready(sigmoid_mod(x))
    y_ref = 1.0 / (1.0 + jnp.exp(-0.4 * x))
    assert y.shape == x.shape and y.dtype == x.dtype
    assert jnp.allclose(y, y_ref, atol=1e-5, rtol=1e-5)

    # Extra check 1: tiny ragged size (numel < 128) -> padded single block.
    x2 = jax.random.normal(jax.random.PRNGKey(1), (3, 5, 7), dtype=jnp.float32)
    y2 = jax.block_until_ready(sigmoid_mod(x2))
    assert jnp.allclose(y2, 1.0 / (1.0 + jnp.exp(-0.4 * x2)), atol=1e-5, rtol=1e-5)

    # Extra check 2: ragged size >= 128 -> bulk kernel + plain-jnp tail.
    x3 = jax.random.normal(jax.random.PRNGKey(2), (5, 31), dtype=jnp.float32)
    y3 = jax.block_until_ready(sigmoid_mod(x3))
    assert jnp.allclose(y3, 1.0 / (1.0 + jnp.exp(-0.4 * x3)), atol=1e-5, rtol=1e-5)

    # Extra check 3: row count not divisible by the sublane multiple ->
    # single full block on 1-TC chips, balanced split on v7x.
    x4 = jax.random.normal(jax.random.PRNGKey(3), (17, 8, 8, 16), dtype=jnp.float32)
    y4 = jax.block_until_ready(sigmoid_mod(x4))
    assert jnp.allclose(y4, 1.0 / (1.0 + jnp.exp(-0.4 * x4)), atol=1e-5, rtol=1e-5)

    # Extra check 4: bf16 input -> dtype-native (16-row) sublane rounding.
    x5 = jax.random.normal(jax.random.PRNGKey(4), (4, 256, 128), dtype=jnp.bfloat16)
    y5 = jax.block_until_ready(sigmoid_mod(x5))
    y5_ref = (1.0 / (1.0 + jnp.exp(-0.4 * x5.astype(jnp.float32)))).astype(jnp.bfloat16)
    assert y5.dtype == jnp.bfloat16 and y5.shape == x5.shape
    assert jnp.allclose(y5.astype(jnp.float32), y5_ref.astype(jnp.float32), atol=2e-2)

    print("KERNEL_OK")
</pallas_src>

<mosaic_0001>
module attributes {stable_mosaic.version = 11 : i64} {
  func.func @_sigmoid_mod_kernel(%arg0: i32, %arg1: memref<2x1024xf32, #tpu.memory_space<vmem>>, %arg2: memref<2x1024xf32, #tpu.memory_space<vmem>>) attributes {dimension_semantics = [#tpu.dimension_semantics<parallel>], iteration_bounds = array<i64: 1>, scalar_prefetch = 0 : i64, scratch_operands = 0 : i64, tpu.core_type = #tpu.core_type<tc>, window_params = [{transform_indices = @transform_0, window_bounds = array<i64: 2, 1024>}, {transform_indices = @transform_1, window_bounds = array<i64: 2, 1024>}]} {
    %c0 = arith.constant 0 : index
    %c0_0 = arith.constant 0 : index
    %0 = vector.load %arg1[%c0, %c0_0] : memref<2x1024xf32, #tpu.memory_space<vmem>>, vector<2x1024xf32>
    %cst = arith.constant 2.000000e-01 : f32
    %1 = vector.broadcast %cst : f32 to vector<2x1024xf32>
    %2 = arith.mulf %1, %0 : vector<2x1024xf32>
    %3 = math.tanh %2 : vector<2x1024xf32>
    %cst_1 = arith.constant 5.000000e-01 : f32
    %4 = vector.broadcast %cst_1 : f32 to vector<2x1024xf32>
    %5 = arith.mulf %4, %3 : vector<2x1024xf32>
    %cst_2 = arith.constant 5.000000e-01 : f32
    %6 = vector.broadcast %cst_2 : f32 to vector<2x1024xf32>
    %7 = arith.addf %5, %6 : vector<2x1024xf32>
    %c0_3 = arith.constant 0 : index
    %c0_4 = arith.constant 0 : index
    %8 = vector.load %arg2[%c0_3, %c0_4] : memref<2x1024xf32, #tpu.memory_space<vmem>>, vector<2x1024xf32>
    tpu.vector_store %arg2[%c0_3, %c0_4], %7 {strides = array<i32>} : memref<2x1024xf32, #tpu.memory_space<vmem>>, vector<2x1024xf32>,
    return
  }
  func.func @transform_0(%arg0: i32) -> (i32, i32) {
    %c0_i32 = arith.constant 0 : i32
    %c0_i32_0 = arith.constant 0 : i32
    return %arg0, %c0_i32 : i32, i32
  }
  func.func @transform_1(%arg0: i32) -> (i32, i32) {
    %c0_i32 = arith.constant 0 : i32
    %c0_i32_0 = arith.constant 0 : i32
    return %arg0, %c0_i32 : i32, i32
  }
}

</mosaic_0001>

<bundles_post_ra>
// kernel: tpu_custom_call.1
= control target key start
LH: loop header
LB: loop body
LE: loop exit
PB: predicated region body
PF: predicated region fallthrough
CT: control target
= control target key end

     0   :  { %6 = vsyncpa [#allocation3], 0  ;;  %s138_s0 = inlined_call_operand.hbm [shape: f32[2,1024], index: 0, kind: input, shape index: {}]   ;;  %s139_s1 = inlined_call_operand.hbm [shape: f32[2,1024], index: 1, kind: output, shape index: {}]  }
   0x1   :  { %7 = vsyncpa [#allocation4], 0  ;;  %s102_s6 = smov [#allocation2]   ;;  %s54_s10 = scalar_lea.hbm %s138_s0, 256 }
   0x2   :  { %s14_s7 = sshll.u32 %s102_s6, 4  ;;  %p55_p0 = scmp.ne.s32.totalorder %s138_s0, %s54_s10  ;;  %s15_s7 = int_to_ptr.vmem [resolvable:$true] %s14_s7 }
   0x3   :  { %p58_p1 = scmp.lt.u32.totalorder %s54_s10, %s138_s0 }
   0x5   :  { %p60_p2 = pnand %p58_p1, %p55_p0 }
   0x7   :  { %63 = shalt.err (!%p60_p2)
}
   0x8   :  { %s64_s15 = scalar_lea.vmem %s15_s7, 256  ;;  %p69_p4 = scmp.lt.s32.totalorder %s15_s7, %s15_s7 }
   0x9   :  { %p65_p3 = scmp.ne.s32.totalorder %s15_s7, %s64_s15  ;;  %p70_p5 = scmp.lt.s32.totalorder %s64_s15, %s64_s15 }
   0xb   :  { %p71_p6 = por %p70_p5, %p69_p4 }
   0xd   :  { %p72_p7 = pnand %p71_p6, %p65_p3 }
   0xf   :  { %75 = shalt.err (!%p72_p7)
}
  0x10   :  { %17 = dma.hbm_to_vmem [thread:$0]  %s138_s0, 256, %s15_s7, [#allocation3]  }
  0x11   :  { %98 = dma.done.wait [#allocation3], 256  }
  0x12   :  { %99 = vsyncadd [#allocation3], 4294967040  ;;  %v21_v0 = vld [vmem:[#allocation2] sm:$0xff]  ;;  %v22_v1 = vld [vmem:[#allocation2 + $0x8] sm:$0xff]  ;;  %s103_s18 = smov [#allocation5]  }
  0x13   :  { %v23_v2 = vmul.f32 0.2, %v21_v0  ;;  %v24_v3 = vmul.f32 0.2, %v22_v1  ;;  %s39_s19 = sshll.u32 %s103_s18, 4  ;;  %s40_s19 = int_to_ptr.vmem [resolvable:$true] %s39_s19 }
  0x14   :  { %s76_s0 = scalar_lea.vmem %s40_s19, 256  ;;  %p81_p9 = scmp.lt.s32.totalorder %s40_s19, %s40_s19 }
  0x15   :  { %50 = vtanh.f32 %v23_v2  ;;  %p77_p8 = scmp.ne.s32.totalorder %s40_s19, %s76_s0  ;;  %p82_p10 = scmp.lt.s32.totalorder %s76_s0, %s76_s0 }
  0x16   :  { %52 = vtanh.f32 %v24_v3 }
  0x17   :  { %p83_p11 = por %p82_p10, %p81_p9 }
  0x19   :  { %p84_p12 = pnand %p83_p11, %p77_p8 }
  0x1f   :  { %v51_v4 = vpop.eup %50 }
  0x20   :  { %v53_v5 = vpop.eup %52  ;;  %v27_v6 = vmul.f32 0.5, %v51_v4 }
  0x21   :  { %v28_v7 = vmul.f32 0.5, %v53_v5 }
  0x22   :  { %v29_v8 = vadd.f32 0.5, %v27_v6 }
  0x23   :  { %v30_v9 = vadd.f32 0.5, %v28_v7 }
  0x24   :  { %31 = vst [vmem:[#allocation5] sm:$0xff] %v29_v8 }
  0x25   :  { %32 = vst [vmem:[#allocation5 + $0x8] sm:$0xff] %v30_v9 }
  0x26   :  { %87 = shalt.err (!%p84_p12)
}
  0x27   :  { %s88_s22 = scalar_lea.hbm %s139_s1, 256 }
  0x28   :  { %p89_p13 = scmp.ne.s32.totalorder %s139_s1, %s88_s22  ;;  %p92_p0 = scmp.lt.u32.totalorder %s88_s22, %s139_s1 }
  0x2a   :  { %p94_p1 = pnand %p92_p0, %p89_p13 }
  0x2c   :  { %97 = shalt.err (!%p94_p1)
}
  0x2d   :  { %42 = dma.vmem_to_hbm [thread:$0]  %s40_s19, 256, %s139_s1, [#allocation4]  }
  0x2e   :  { %100 = dma.done.wait [#allocation4], 256  }
  0x2f   :  { %101 = vsyncadd [#allocation4], 4294967040 }
  0x30   :  { %46 = vsyncpa [#allocation3], 1 }
  0x31   :  { %47 = vsyncpa [#allocation4], 1 }

</bundles_post_ra>
